<compile_context>
chip_gen: v7x
topology: tpu7x:2x2x1
jax: 0.10.0
libtpu: 0.0.40
codegen_flags: <defaults>
</compile_context>

<pallas_src>
import math

import jax
import jax.numpy as jnp
from jax.experimental import pallas as pl
from jax.experimental.pallas import tpu as pltpu

_LANE = 128
_SUBLANE = 8


def _round_up(x, m):
    return (x + m - 1) // m * m


def mlp_kernel(x_ref, w1_ref, b1_ref, w2_ref, b2_ref, w3_ref, b3_ref, o_ref):
    # hidden_1 + relu
    h1 = jnp.dot(x_ref[...], w1_ref[...], preferred_element_type=jnp.float32) + b1_ref[...]
    h1 = jnp.maximum(h1, 0.0)
    # hidden_2 + relu
    h2 = jnp.dot(h1, w2_ref[...], preferred_element_type=jnp.float32) + b2_ref[...]
    h2 = jnp.maximum(h2, 0.0)
    # hidden_3 (logit columns beyond the real out_dim carry a -1e30 bias, so
    # they contribute exp(...) == 0 to the softmax and store as exact zeros)
    logits = jnp.dot(h2, w3_ref[...], preferred_element_type=jnp.float32) + b3_ref[...]
    # numerically stable softmax over the feature axis (exact divide: the
    # normalization is negligible compute, and exactness keeps row sums == 1)
    m = jnp.max(logits, axis=1, keepdims=True)
    e = jnp.exp(logits - m)
    denom = jnp.sum(e, axis=1, keepdims=True)
    o_ref[...] = (e / denom).astype(o_ref.dtype)


def custom_mlp_forward(x, params, *, tile_b=512):
    """Forward pass. x: [batch, input_dim] f32. Weights stored as [in, out]."""
    w1, b1, w2, b2, w3, b3 = params
    batch, input_dim = x.shape
    out_dim = w3.shape[1]

    # --- lane-dense output: pad the output feature dim up to a 128-lane slab.
    out_pad = _round_up(out_dim, _LANE)
    pad_cols = out_pad - out_dim
    if pad_cols:
        w3p = jnp.pad(w3, ((0, 0), (0, pad_cols)))
        # -1e30 bias => padded logits are hugely negative => softmax prob == 0
        b3p = jnp.pad(b3, ((0, 0), (0, pad_cols)), constant_values=-1e30)
    else:
        w3p, b3p = w3, b3

    # --- batch grid: pad batch to a multiple of the tile (>= sublane count).
    tile_b = int(min(tile_b, _round_up(batch, _SUBLANE)))
    tile_b = _round_up(tile_b, _SUBLANE)
    batch_pad = _round_up(batch, tile_b)
    if batch_pad != batch:
        x = jnp.pad(x, ((0, batch_pad - batch), (0, 0)))

    grid = (batch_pad // tile_b,)

    # Weights/biases: full-array blocks, constant index map -> VMEM-resident,
    # never re-DMA'd across grid steps.
    def resident(a):
        return pl.BlockSpec(a.shape, lambda i: (0,) * a.ndim)

    out = pl.pallas_call(
        mlp_kernel,
        out_shape=jax.ShapeDtypeStruct((batch_pad, out_pad), x.dtype),
        grid=grid,
        in_specs=[
            pl.BlockSpec((tile_b, input_dim), lambda i: (i, 0)),  # x: pipelined over batch
            resident(w1), resident(b1),
            resident(w2), resident(b2),
            resident(w3p), resident(b3p),
        ],
        out_specs=pl.BlockSpec((tile_b, out_pad), lambda i: (i, 0)),
        compiler_params=pltpu.CompilerParams(
            dimension_semantics=("parallel",),  # batch axis -> megacore on v7x
        ),
    )(x, w1, b1, w2, b2, w3p, b3p)

    return out[:batch, :out_dim]


def init_params(key, input_dim, hidden_dim, output_dim):
    """Deterministic init mirroring the PyTorch module's explicit init scheme.

    kaiming_uniform_(relu) for hidden_1/hidden_2 weights, xavier_uniform_ for
    hidden_3 weight, default Linear uniform for biases. Weights are stored
    transposed ([in, out]) relative to torch's [out, in]."""
    k1, k2, k3, kb1, kb2, kb3 = jax.random.split(key, 6)

    def kaiming_uniform(k, fan_in, fan_out):
        gain = math.sqrt(2.0)  # relu
        bound = gain * math.sqrt(3.0 / fan_in)
        return jax.random.uniform(k, (fan_in, fan_out), jnp.float32, -bound, bound)

    def xavier_uniform(k, fan_in, fan_out):
        bound = math.sqrt(6.0 / (fan_in + fan_out))
        return jax.random.uniform(k, (fan_in, fan_out), jnp.float32, -bound, bound)

    def bias_uniform(k, fan_in, fan_out):
        bound = 1.0 / math.sqrt(fan_in)
        return jax.random.uniform(k, (1, fan_out), jnp.float32, -bound, bound)

    w1 = kaiming_uniform(k1, input_dim, hidden_dim)
    b1 = bias_uniform(kb1, input_dim, hidden_dim)
    w2 = kaiming_uniform(k2, hidden_dim, hidden_dim)
    b2 = bias_uniform(kb2, hidden_dim, hidden_dim)
    w3 = xavier_uniform(k3, hidden_dim, output_dim)
    b3 = bias_uniform(kb3, hidden_dim, output_dim)
    return (w1, b1, w2, b2, w3, b3)


def reference_forward(x, params):
    w1, b1, w2, b2, w3, b3 = params
    h = jnp.maximum(x @ w1 + b1, 0.0)
    h = jnp.maximum(h @ w2 + b2, 0.0)
    logits = h @ w3 + b3
    return jax.nn.softmax(logits, axis=1)


if __name__ == "__main__":
    input_dim, hidden_dim, output_dim = 16, 32, 8

    key = jax.random.PRNGKey(0)
    kx, kp, kx2 = jax.random.split(key, 3)
    params = init_params(kp, input_dim, hidden_dim, output_dim)

    # Small case (matches the module spec's tiny shapes).
    batch = 4
    x = jax.random.normal(kx, (batch, input_dim), dtype=jnp.float32)
    out = jax.block_until_ready(custom_mlp_forward(x, params))
    ref = reference_forward(x, params)
    assert out.shape == (batch, output_dim)
    assert jnp.allclose(out, ref, atol=1e-4, rtol=1e-4), "mismatch vs JAX reference (small)"
    assert jnp.allclose(jnp.sum(out, axis=1), jnp.ones((batch,)), atol=1e-4)

    # Larger batch to exercise the multi-step pipelined grid (grid=(4,)).
    batch2 = 1024
    x2 = jax.random.normal(kx2, (batch2, input_dim), dtype=jnp.float32)
    out2 = jax.block_until_ready(custom_mlp_forward(x2, params, tile_b=256))
    ref2 = reference_forward(x2, params)
    assert out2.shape == (batch2, output_dim)
    assert jnp.allclose(out2, ref2, atol=1e-4, rtol=1e-4), "mismatch vs JAX reference (large)"
    assert jnp.allclose(jnp.sum(out2, axis=1), jnp.ones((batch2,)), atol=1e-4)

    print("KERNEL_OK")
</pallas_src>

<mosaic_0001>
module attributes {stable_mosaic.version = 11 : i64} {
  func.func @mlp_kernel(%arg0: i32, %arg1: memref<8x16xf32, #tpu.memory_space<vmem>>, %arg2: memref<16x32xf32, #tpu.memory_space<vmem>>, %arg3: memref<1x32xf32, #tpu.memory_space<vmem>>, %arg4: memref<32x32xf32, #tpu.memory_space<vmem>>, %arg5: memref<1x32xf32, #tpu.memory_space<vmem>>, %arg6: memref<32x128xf32, #tpu.memory_space<vmem>>, %arg7: memref<1x128xf32, #tpu.memory_space<vmem>>, %arg8: memref<8x128xf32, #tpu.memory_space<vmem>>) attributes {dimension_semantics = [#tpu.dimension_semantics<parallel>], iteration_bounds = array<i64: 1>, scalar_prefetch = 0 : i64, scratch_operands = 0 : i64, tpu.core_type = #tpu.core_type<tc>, window_params = [{transform_indices = @transform_0, window_bounds = array<i64: 8, 16>}, {pipeline_mode = #tpu.pipeline_mode<synchronous>, transform_indices = @transform_1, window_bounds = array<i64: 16, 32>}, {pipeline_mode = #tpu.pipeline_mode<synchronous>, transform_indices = @transform_2, window_bounds = array<i64: 1, 32>}, {pipeline_mode = #tpu.pipeline_mode<synchronous>, transform_indices = @transform_3, window_bounds = array<i64: 32, 32>}, {pipeline_mode = #tpu.pipeline_mode<synchronous>, transform_indices = @transform_4, window_bounds = array<i64: 1, 32>}, {pipeline_mode = #tpu.pipeline_mode<synchronous>, transform_indices = @transform_5, window_bounds = array<i64: 32, 128>}, {pipeline_mode = #tpu.pipeline_mode<synchronous>, transform_indices = @transform_6, window_bounds = array<i64: 1, 128>}, {transform_indices = @transform_7, window_bounds = array<i64: 8, 128>}]} {
    %c0 = arith.constant 0 : index
    %c0_0 = arith.constant 0 : index
    %0 = vector.load %arg1[%c0, %c0_0] : memref<8x16xf32, #tpu.memory_space<vmem>>, vector<8x16xf32>
    %c0_1 = arith.constant 0 : index
    %c0_2 = arith.constant 0 : index
    %1 = vector.load %arg2[%c0_1, %c0_2] : memref<16x32xf32, #tpu.memory_space<vmem>>, vector<16x32xf32>
    %cst = arith.constant dense<0.000000e+00> : vector<8x32xf32>
    %2 = tpu.matmul %0, %1, %cst {dimension_numbers = #tpu.dot_dimension_numbers<[1], [0], [0], [1], [0, 0, 1, 1], [], []>} : vector<8x16xf32>, vector<16x32xf32>, vector<8x32xf32> -> vector<8x32xf32>
    %c0_3 = arith.constant 0 : index
    %c0_4 = arith.constant 0 : index
    %3 = vector.load %arg3[%c0_3, %c0_4] : memref<1x32xf32, #tpu.memory_space<vmem>>, vector<1x32xf32>
    %4 = vector.broadcast %3 : vector<1x32xf32> to vector<8x32xf32>
    %5 = arith.addf %2, %4 : vector<8x32xf32>
    %cst_5 = arith.constant 0.000000e+00 : f32
    %6 = vector.broadcast %cst_5 : f32 to vector<8x32xf32>
    %7 = arith.maximumf %5, %6 : vector<8x32xf32>
    %c0_6 = arith.constant 0 : index
    %c0_7 = arith.constant 0 : index
    %8 = vector.load %arg4[%c0_6, %c0_7] : memref<32x32xf32, #tpu.memory_space<vmem>>, vector<32x32xf32>
    %cst_8 = arith.constant dense<0.000000e+00> : vector<8x32xf32>
    %9 = tpu.matmul %7, %8, %cst_8 {dimension_numbers = #tpu.dot_dimension_numbers<[1], [0], [0], [1], [0, 0, 1, 1], [], []>} : vector<8x32xf32>, vector<32x32xf32>, vector<8x32xf32> -> vector<8x32xf32>
    %c0_9 = arith.constant 0 : index
    %c0_10 = arith.constant 0 : index
    %10 = vector.load %arg5[%c0_9, %c0_10] : memref<1x32xf32, #tpu.memory_space<vmem>>, vector<1x32xf32>
    %11 = vector.broadcast %10 : vector<1x32xf32> to vector<8x32xf32>
    %12 = arith.addf %9, %11 : vector<8x32xf32>
    %cst_11 = arith.constant 0.000000e+00 : f32
    %13 = vector.broadcast %cst_11 : f32 to vector<8x32xf32>
    %14 = arith.maximumf %12, %13 : vector<8x32xf32>
    %c0_12 = arith.constant 0 : index
    %c0_13 = arith.constant 0 : index
    %15 = vector.load %arg6[%c0_12, %c0_13] : memref<32x128xf32, #tpu.memory_space<vmem>>, vector<32x128xf32>
    %cst_14 = arith.constant dense<0.000000e+00> : vector<8x128xf32>
    %16 = tpu.matmul %14, %15, %cst_14 {dimension_numbers = #tpu.dot_dimension_numbers<[1], [0], [0], [1], [0, 0, 1, 1], [], []>} : vector<8x32xf32>, vector<32x128xf32>, vector<8x128xf32> -> vector<8x128xf32>
    %c0_15 = arith.constant 0 : index
    %c0_16 = arith.constant 0 : index
    %17 = vector.load %arg7[%c0_15, %c0_16] : memref<1x128xf32, #tpu.memory_space<vmem>>, vector<1x128xf32>
    %18 = vector.broadcast %17 : vector<1x128xf32> to vector<8x128xf32>
    %19 = arith.addf %16, %18 : vector<8x128xf32>
    %cst_17 = arith.constant dense<0xFF800000> : vector<8xf32>
    %20 = vector.multi_reduction <maximumf>, %19, %cst_17 [1] : vector<8x128xf32> to vector<8xf32>
    %21 = vector.shape_cast %20 : vector<8xf32> to vector<8x1xf32>
    %22 = vector.broadcast %21 : vector<8x1xf32> to vector<8x128xf32>
    %23 = arith.subf %19, %22 : vector<8x128xf32>
    %24 = math.exp %23 : vector<8x128xf32>
    %cst_18 = arith.constant dense<0.000000e+00> : vector<8xf32>
    %25 = vector.multi_reduction <add>, %24, %cst_18 [1] : vector<8x128xf32> to vector<8xf32>
    %26 = vector.shape_cast %25 : vector<8xf32> to vector<8x1xf32>
    %27 = vector.broadcast %26 : vector<8x1xf32> to vector<8x128xf32>
    %28 = arith.divf %24, %27 : vector<8x128xf32>
    %c0_19 = arith.constant 0 : index
    %c0_20 = arith.constant 0 : index
    %29 = vector.load %arg8[%c0_19, %c0_20] : memref<8x128xf32, #tpu.memory_space<vmem>>, vector<8x128xf32>
    tpu.vector_store %arg8[%c0_19, %c0_20], %28 {strides = array<i32>} : memref<8x128xf32, #tpu.memory_space<vmem>>, vector<8x128xf32>,
    return
  }
  func.func @transform_0(%arg0: i32) -> (i32, i32) {
    %c0_i32 = arith.constant 0 : i32
    %c0_i32_0 = arith.constant 0 : i32
    return %arg0, %c0_i32 : i32, i32
  }
  func.func @transform_1(%arg0: i32) -> (i32, i32) {
    %c0_i32 = arith.constant 0 : i32
    %c0_i32_0 = arith.constant 0 : i32
    %c0_i32_1 = arith.constant 0 : i32
    return %c0_i32, %c0_i32_0 : i32, i32
  }
  func.func @transform_2(%arg0: i32) -> (i32, i32) {
    %c0_i32 = arith.constant 0 : i32
    %c0_i32_0 = arith.constant 0 : i32
    %c0_i32_1 = arith.constant 0 : i32
    return %c0_i32, %c0_i32_0 : i32, i32
  }
  func.func @transform_3(%arg0: i32) -> (i32, i32) {
    %c0_i32 = arith.constant 0 : i32
    %c0_i32_0 = arith.constant 0 : i32
    %c0_i32_1 = arith.constant 0 : i32
    return %c0_i32, %c0_i32_0 : i32, i32
  }
  func.func @transform_4(%arg0: i32) -> (i32, i32) {
    %c0_i32 = arith.constant 0 : i32
    %c0_i32_0 = arith.constant 0 : i32
    %c0_i32_1 = arith.constant 0 : i32
    return %c0_i32, %c0_i32_0 : i32, i32
  }
  func.func @transform_5(%arg0: i32) -> (i32, i32) {
    %c0_i32 = arith.constant 0 : i32
    %c0_i32_0 = arith.constant 0 : i32
    %c0_i32_1 = arith.constant 0 : i32
    return %c0_i32, %c0_i32_0 : i32, i32
  }
  func.func @transform_6(%arg0: i32) -> (i32, i32) {
    %c0_i32 = arith.constant 0 : i32
    %c0_i32_0 = arith.constant 0 : i32
    %c0_i32_1 = arith.constant 0 : i32
    return %c0_i32, %c0_i32_0 : i32, i32
  }
  func.func @transform_7(%arg0: i32) -> (i32, i32) {
    %c0_i32 = arith.constant 0 : i32
    %c0_i32_0 = arith.constant 0 : i32
    return %arg0, %c0_i32 : i32, i32
  }
}

</mosaic_0001>

<bundles_post_ra>
// kernel: tpu_custom_call.1
= control target key start
LH: loop header
LB: loop body
LE: loop exit
PB: predicated region body
PF: predicated region fallthrough
CT: control target
= control target key end

     0   :  { %12 = vsyncpa [#allocation3], 0  ;;  %s688_s0 = inlined_call_operand.hbm [shape: f32[8,16], index: 0, kind: input, shape index: {}]   ;;  %s689_s1 = inlined_call_operand.hbm [shape: f32[16,32], index: 1, kind: input, shape index: {}]   ;;  %s690_s2 = inlined_call_operand.vmem [shape: f32[1,32], index: 2, kind: input, shape index: {}]   ;;  %s691_s3 = inlined_call_operand.hbm [shape: f32[32,32], index: 3, kind: input, shape index: {}]   ;;  %s692_s4 = inlined_call_operand.vmem [shape: f32[1,32], index: 4, kind: input, shape index: {}]   ;;  %s693_s5 = inlined_call_operand.hbm [shape: f32[32,128], index: 5, kind: input, shape index: {}]   ;;  %s694_s6 = inlined_call_operand.vmem [shape: f32[1,128], index: 6, kind: input, shape index: {}]   ;;  %s695_s7 = inlined_call_operand.hbm [shape: f32[8,128], index: 7, kind: output, shape index: {}]  }
   0x1   :  { %13 = vsyncpa [#allocation6], 0 }
   0x2   :  { %14 = vsyncpa [#allocation9], 0 }
   0x3   :  { %15 = vsyncpa [#allocation4], 0  ;;  %s557_s24 = smov [#allocation5]   ;;  %s439_s28 = scalar_lea.hbm %s689_s1, 256 }
   0x4   :  { %s31_s25 = sshll.u32 %s557_s24, 4  ;;  %p440_p0 = scmp.ne.s32.totalorder %s689_s1, %s439_s28  ;;  %s32_s25 = int_to_ptr.vmem [resolvable:$true] %s31_s25 }
   0x5   :  { %p443_p1 = scmp.lt.u32.totalorder %s439_s28, %s689_s1 }
   0x7   :  { %p445_p2 = pnand %p443_p1, %p440_p0 }
   0x9   :  { %448 = shalt.err (!%p445_p2)
}
   0xa   :  { %s449_s10 = scalar_lea.vmem %s32_s25, 256  ;;  %p454_p4 = scmp.lt.s32.totalorder %s32_s25, %s32_s25 }
   0xb   :  { %p450_p3 = scmp.ne.s32.totalorder %s32_s25, %s449_s10  ;;  %p455_p5 = scmp.lt.s32.totalorder %s449_s10, %s449_s10 }
   0xd   :  { %p456_p6 = por %p455_p5, %p454_p4 }
   0xf   :  { %p457_p7 = pnand %p456_p6, %p450_p3 }
  0x11   :  { %460 = shalt.err (!%p457_p7)
}
  0x12   :  { %s558_s11 = smov 128   ;;  %s559_s12 = smov 8  }
  0x13   :  { %37 = dma.hbm_to_vmem [thread:$0]  %s689_s1, 256, %s32_s25, [#allocation6], %s558_s11, %s558_s11, %s559_s12  }
  0x14   :  { %s560_s15 = smov [#allocation2]   ;;  %s561_s17 = smov [#allocation7]  }
  0x15   :  { %s22_s16 = sshll.u32 %s560_s15, 4  ;;  %s45_s18 = sshll.u32 %s561_s17, 4  ;;  %s23_s16 = int_to_ptr.vmem [resolvable:$true] %s22_s16  ;;  %s46_s18 = int_to_ptr.vmem [resolvable:$true] %s45_s18 }
  0x16   :  { %s461_s21 = scalar_lea.hbm %s688_s0, 128 }
  0x17   :  { %p462_p8 = scmp.ne.s32.totalorder %s688_s0, %s461_s21  ;;  %p465_p9 = scmp.lt.u32.totalorder %s461_s21, %s688_s0 }
  0x19   :  { %p467_p10 = pnand %p465_p9, %p462_p8 }
  0x1b   :  { %470 = shalt.err (!%p467_p10)
}
  0x1c   :  { %s471_s1 = scalar_lea.vmem %s23_s16, 128  ;;  %p476_p12 = scmp.lt.s32.totalorder %s23_s16, %s23_s16 }
  0x1d   :  { %p472_p11 = scmp.ne.s32.totalorder %s23_s16, %s471_s1  ;;  %p477_p13 = scmp.lt.s32.totalorder %s471_s1, %s471_s1 }
  0x1f   :  { %p478_p0 = por %p477_p13, %p476_p12 }
  0x21   :  { %p479_p1 = pnand %p478_p0, %p472_p11 }
  0x23   :  { %482 = shalt.err (!%p479_p1)
}
  0x24   :  { %25 = dma.hbm_to_vmem [thread:$0]  %s688_s0, 128, %s23_s16, [#allocation3]  }
  0x25   :  { %s483_s30 = scalar_lea.hbm %s691_s3, 512 }
  0x26   :  { %p484_p2 = scmp.ne.s32.totalorder %s691_s3, %s483_s30  ;;  %p487_p3 = scmp.lt.u32.totalorder %s483_s30, %s691_s3 }
  0x28   :  { %p489_p4 = pnand %p487_p3, %p484_p2 }
  0x2a   :  { %492 = shalt.err (!%p489_p4)
}
  0x2b   :  { %s493_s14 = scalar_lea.vmem %s46_s18, 512  ;;  %p498_p6 = scmp.lt.s32.totalorder %s46_s18, %s46_s18 }
  0x2c   :  { %p494_p5 = scmp.ne.s32.totalorder %s46_s18, %s493_s14  ;;  %p499_p7 = scmp.lt.s32.totalorder %s493_s14, %s493_s14 }
  0x2e   :  { %p500_p8 = por %p499_p7, %p498_p6 }
  0x30   :  { %p501_p9 = pnand %p500_p8, %p494_p5 }
  0x32   :  { %504 = shalt.err (!%p501_p9)
}
  0x33   :  { %51 = dma.hbm_to_vmem [thread:$0]  %s691_s3, 512, %s46_s18, [#allocation6], %s558_s11, %s558_s11, %s559_s12  }
  0x34   :  { %s562_s16 = smov [#allocation8]   ;;  %s505_s21 = scalar_lea.hbm %s693_s5, 512 }
  0x35   :  { %s59_s17 = sshll.u32 %s562_s16, 4  ;;  %p506_p10 = scmp.ne.s32.totalorder %s693_s5, %s505_s21  ;;  %s60_s17 = int_to_ptr.vmem [resolvable:$true] %s59_s17 }
  0x36   :  { %p509_p11 = scmp.lt.u32.totalorder %s505_s21, %s693_s5 }
  0x38   :  { %p511_p12 = pnand %p509_p11, %p506_p10 }
  0x3a   :  { %514 = shalt.err (!%p511_p12)
}
  0x3b   :  { %s515_s1 = scalar_lea.vmem %s60_s17, 512  ;;  %p520_p0 = scmp.lt.s32.totalorder %s60_s17, %s60_s17 }
  0x3c   :  { %p516_p13 = scmp.ne.s32.totalorder %s60_s17, %s515_s1  ;;  %p521_p1 = scmp.lt.s32.totalorder %s515_s1, %s515_s1 }
  0x3e   :  { %p522_p2 = por %p521_p1, %p520_p0 }
  0x40   :  { %p523_p3 = pnand %p522_p2, %p516_p13 }
  0x42   :  { %526 = shalt.err (!%p523_p3)
}
  0x43   :  { %65 = dma.hbm_to_vmem [thread:$0]  %s693_s5, 512, %s60_s17, [#allocation9], %s558_s11, %s558_s11, %s559_s12  }
  0x44   :  { %549 = dma.done.wait [#allocation3], 128  }
  0x45   :  { %550 = vsyncadd [#allocation3], 4294967168 }
  0x46   :  { %551 = dma.done.wait [#allocation6], 768  }
  0x47   :  { %552 = vsyncadd [#allocation6], 4294966528 }
  0x48   :  { %553 = dma.done.wait [#allocation9], 512  }
  0x49   :  { %554 = vsyncadd [#allocation9], 4294966784  ;;  %v563_v0 = vmov 0.0|0.0   ;;  %vm564_vm0 = vmmov 0   ;;  %v565_v1 = vmov 0.0   ;;  %v81_v2 = vld [vmem:[#allocation5] sm:$0xff] }
  0x4a   :  { %410 = vmatprep.subr.bf16.mxu0 %v563_v0  ;;  %385 = vmatprep.mubr.msk.f32.mxu0 %vm564_vm0, %v565_v1  ;;  %v82_v3 = vld [vmem:[#allocation5 + $0x8] sm:$0xff]  ;;  %v165_v5 = vld [vmem:[#allocation7] sm:$0xff]  ;;  %v166_v6 = vld [vmem:[#allocation7 + $0x8] sm:$0xff]  ;;  %vm90_vm1 = vcmask 130048   ;;  %vm176_vm2 = vcmask 261120  }
  0x4b   :  { %413 = vmatprep.subr.bf16.mxu1 %v563_v0  ;;  %396 = vmatprep.mubr.msk.f32.mxu1 %vm564_vm0, %v565_v1  ;;  %v411_v4 = vpack.c.bf16 %v82_v3, %v81_v2  ;;  %v414_v7 = vpack.c.bf16 %v166_v6, %v165_v5  ;;  %v80_v8 = vld [vmem:[#allocation2] sm:$0xff]  ;;  %v167_v9 = vld [vmem:[#allocation7 + $0x10] sm:$0xff]  ;;  %v168_v10 = vld [vmem:[#allocation7 + $0x18] sm:$0xff] }
  0x4c   :  { %v417_v11 = vpack.c.bf16 %v168_v10, %v167_v9  ;;  %v251_v12 = vld [vmem:[#allocation8] sm:$0xff]  ;;  %v252_v13 = vld [vmem:[#allocation8 + $0x8] sm:$0xff]  ;;  %v253_v20 = vld [vmem:[#allocation8 + $0x10] sm:$0xff] }
  0x4d   :  { %412 = vmatpush3.bf16.msra.mxu0 %v411_v4  ;;  %415 = vmatpush3.bf16.msra.mxu1 %v414_v7  ;;  %v420_v14 = vpack.c.bf16 %v252_v13, %v251_v12  ;;  %v362_v15 = vld [vmem:[%s690_s2] ss:$0 sm:$0xff]  ;;  %v254_v21 = vld [vmem:[#allocation8 + $0x18] sm:$0xff] }
  0x4e   :  { %419 = vmatprep.subr.bf16.mxu0 %v563_v0  ;;  %416 = vmatprep.subr.bf16.mxu1 %v563_v0  ;;  %v423_v22 = vpack.c.bf16 %v254_v21, %v253_v20  ;;  %v364_v23 = vld [vmem:[%s692_s4] ss:$0 sm:$0xff]  ;;  %s566_s4 = smov [#allocation10]  }
  0x4f   :  { %v366_v28 = vld [vmem:[%s694_s6] ss:$0 sm:$0xff]  ;;  %s351_s28 = sshll.u32 %s566_s4, 4  ;;  %s352_s28 = int_to_ptr.vmem [resolvable:$true] %s351_s28 }
  0x50   :  { %386 = vmatmul.mubr.msk.f32.vlgmr.msra.gmra.mrb[0].mxu0 %vm90_vm1, %v80_v8  ;;  %s527_s29 = scalar_lea.vmem %s352_s28, 128  ;;  %p532_p5 = scmp.lt.s32.totalorder %s352_s28, %s352_s28 }
  0x51   :  { %407 = vmatprep.mubr.msk.f32.mxu0 %vm564_vm0, %v565_v1  ;;  %418 = vmatpush3.bf16.msra.mxu1 %v417_v11  ;;  %p528_p4 = scmp.ne.s32.totalorder %s352_s28, %s527_s29  ;;  %p533_p6 = scmp.lt.s32.totalorder %s527_s29, %s527_s29 }
  0x52   :  { %421 = vmatpush3.bf16.msra.mxu0 %v420_v14 }
  0x53   :  { %422 = vmatprep.subr.bf16.mxu0 %v563_v0  ;;  %p534_p7 = por %p533_p6, %p532_p5 }
  0x55   :  { %p535_p8 = pnand %p534_p7, %p528_p4 }
  0x56   :  { %424 = vmatpush3.bf16.msra.mxu0 %v423_v22 }
 0x123   :  { %v160_v16 = vpop.f32.mrb[0].mxu0 }
 0x124   :  { %v161_v17 = vadd.f32 %v362_v15, %v160_v16  ;;  %v387_v18 = vpop.f32.mrb[1].mxu0 }
 0x126   :  { %v164_v19 = vmax.f32 %v161_v17, 0.0 }
 0x128   :  { %397 = vmatmul.mubr.msk.f32.vlgmr.msra.gmra.mrb[0].mxu1 %vm176_vm2, %v164_v19 }
 0x1fb   :  { %v246_v24 = vpop.f32.mrb[0].mxu1 }
 0x1fc   :  { %v247_v25 = vadd.f32 %v364_v23, %v246_v24  ;;  %v398_v26 = vpop.f32.mrb[1].mxu1 }
 0x1fe   :  { %v250_v27 = vmax.f32 %v247_v25, 0.0 }
 0x200   :  { %408 = vmatmul.mubr.msk.f32.vlgmr.msra.gmra.mrb[2].mxu0 %vm176_vm2, %v250_v27 }
 0x2d3   :  { %v331_v29 = vpop.f32.mrb[2].mxu0 }
 0x2d4   :  { %v332_v30 = vadd.f32 %v366_v28, %v331_v29  ;;  %v409_v31 = vpop.f32.mrb[3].mxu0 }
 0x2d6   :  { %335 = vmax.xlane.f32.xlu0 %v332_v30 }
 0x363   :  { %v336_v32 = vpop.xlane.xlu0 %335 }
 0x364   :  { %v337_v33 = vsub.f32 %v332_v30, %v336_v32 }
 0x366   :  { %v338_v34 = vmul.f32 1.442695, %v337_v33 }
 0x368   :  { %435 = vpow2.f32 %v338_v34 }
 0x372   :  { %v436_v35 = vpop.eup %435 }
 0x373   :  { %340 = vadd.xlane.f32.xlu0 %v436_v35 }
 0x400   :  { %v341_v36 = vpop.xlane.xlu0 %340 }
 0x401   :  { %437 = vrcp.f32 %v341_v36 }
 0x40b   :  { %v438_v37 = vpop.eup %437 }
 0x40c   :  { %v343_v38 = vmul.f32 %v438_v37, %v436_v35 }
 0x40e   :  { %344 = vst [vmem:[#allocation10] sm:$0xff] %v343_v38 }
 0x40f   :  { %538 = shalt.err (!%p535_p8)
}
 0x410   :  { %s539_s8 = scalar_lea.hbm %s695_s7, 128 }
 0x411   :  { %p540_p9 = scmp.ne.s32.totalorder %s695_s7, %s539_s8  ;;  %p543_p10 = scmp.lt.u32.totalorder %s539_s8, %s695_s7 }
 0x413   :  { %p545_p11 = pnand %p543_p10, %p540_p9 }
 0x415   :  { %548 = shalt.err (!%p545_p11)
}
 0x416   :  { %354 = dma.vmem_to_hbm [thread:$0]  %s352_s28, 128, %s695_s7, [#allocation4]  }
 0x417   :  { %555 = dma.done.wait [#allocation4], 128  }
 0x418   :  { %556 = vsyncadd [#allocation4], 4294967168 }
 0x419   :  { %358 = vsyncpa [#allocation3], 1 }
 0x41a   :  { %359 = vsyncpa [#allocation6], 1 }
 0x41b   :  { %360 = vsyncpa [#allocation9], 1 }
 0x41c   :  { %361 = vsyncpa [#allocation4], 1 }

</bundles_post_ra>
